<compile_context>
chip_gen: v7x
topology: tpu7x:2x2x1
jax: 0.10.0
libtpu: 0.0.40
codegen_flags: <defaults>
</compile_context>

<pallas_src>
import functools

import jax
import jax.numpy as jnp
import numpy as np
from jax.experimental import pallas as pl
from jax.experimental.pallas import tpu as pltpu

EPS = 1e-5
LANE = 128
VMEM_LIMIT = 32 * 1024 * 1024  # explicit: v5e default is only 16 MiB


def _round_up(x, m):
    return (x + m - 1) // m * m


# --------------------------- pass 1: x @ W1 + stats ---------------------------
def mlp1_pass1_kernel(x_ref, w1_ref, h_ref, sum_ref, sq_ref):
    @pl.when(pl.program_id(0) == 0)
    def _init():
        sum_ref[...] = jnp.zeros_like(sum_ref)
        sq_ref[...] = jnp.zeros_like(sq_ref)

    # bf16 x bf16 -> f32 accumulate on the MXU.
    h = jnp.dot(x_ref[...], w1_ref[...], preferred_element_type=jnp.float32)
    h_ref[...] = h.astype(h_ref.dtype)

    # Partial batch statistics (padded rows are exact zeros -> no contribution).
    sum_ref[...] += jnp.sum(h, axis=0, keepdims=True)
    sq_ref[...] += jnp.sum(h * h, axis=0, keepdims=True)


# ------------------- pass 2: fused BN FMA + ReLU + (. @ W2) -------------------
def mlp1_pass2_kernel(h_ref, a_ref, b_ref, w2_ref, o_ref):
    h = h_ref[...].astype(jnp.float32)
    h = jnp.maximum(h * a_ref[...] + b_ref[...], 0.0)  # BN folded into one FMA
    o_ref[...] = jnp.dot(h.astype(w2_ref.dtype), w2_ref[...],
                         preferred_element_type=jnp.float32).astype(o_ref.dtype)


# ------------------------------- parameter prep -------------------------------
def prepare_params(w1, w2, gamma, beta):
    """One-time setup: transpose to [in, out], zero-pad to 128 lanes, cast bf16."""
    hidden, din = w1.shape
    dout = w2.shape[0]
    din_p, h_p, dout_p = (_round_up(d, LANE) for d in (din, hidden, dout))

    w1t = jnp.zeros((din_p, h_p), jnp.bfloat16).at[:din, :hidden].set(
        w1.T.astype(jnp.bfloat16))
    w2t = jnp.zeros((h_p, dout_p), jnp.bfloat16).at[:hidden, :dout].set(
        w2.T.astype(jnp.bfloat16))
    gamma_p = jnp.zeros((1, h_p), jnp.float32).at[:, :hidden].set(
        gamma.astype(jnp.float32))
    beta_p = jnp.zeros((1, h_p), jnp.float32).at[:, :hidden].set(
        beta.astype(jnp.float32))
    return w1t, w2t, gamma_p, beta_p


# ---------------------------------- forward -----------------------------------
@functools.partial(jax.jit, static_argnames=("out_dim", "tile_n_max"))
def mlp1_forward(x, w1t, w2t, gamma_p, beta_p, *, out_dim, tile_n_max=256):
    n, din = x.shape
    din_p, h_p = w1t.shape
    dout_p = w2t.shape[1]

    # N tile: multiple of 16 (bf16 sublane packing), capped at tile_n_max.
    tn = min(tile_n_max, _round_up(n, 16))
    n_pad = _round_up(n, tn)
    nt = n_pad // tn

    # Pad + cast x once (bf16 halves the HBM stream into pass 1).
    xb = jnp.zeros((n_pad, din_p), jnp.bfloat16).at[:n, :din].set(
        x.astype(jnp.bfloat16))

    # ---- pass 1: tiled matmul + resident stats accumulators ----
    h_bf, sum_h, sq_h = pl.pallas_call(
        mlp1_pass1_kernel,
        out_shape=(
            jax.ShapeDtypeStruct((n_pad, h_p), jnp.bfloat16),
            jax.ShapeDtypeStruct((1, h_p), jnp.float32),
            jax.ShapeDtypeStruct((1, h_p), jnp.float32),
        ),
        grid=(nt,),
        in_specs=[
            pl.BlockSpec((tn, din_p), lambda i: (i, 0)),
            pl.BlockSpec((din_p, h_p), lambda i: (0, 0)),  # W1 resident
        ],
        out_specs=(
            pl.BlockSpec((tn, h_p), lambda i: (i, 0)),
            pl.BlockSpec((1, h_p), lambda i: (0, 0)),      # resident accumulator
            pl.BlockSpec((1, h_p), lambda i: (0, 0)),      # resident accumulator
        ),
        compiler_params=pltpu.CompilerParams(
            dimension_semantics=("arbitrary",),
            vmem_limit_bytes=VMEM_LIMIT),
    )(xb, w1t)

    # ---- glue: fold BatchNorm into a single FMA (tiny [1,H] vector math) ----
    inv_n = 1.0 / float(n)                       # true batch size, not padded
    mean = sum_h * inv_n
    var = jnp.maximum(sq_h * inv_n - mean * mean, 0.0)
    a = gamma_p * jax.lax.rsqrt(var + EPS)
    b = beta_p - mean * a

    # ---- pass 2: normalize + ReLU + second matmul (parallel over tiles) ----
    out_p = pl.pallas_call(
        mlp1_pass2_kernel,
        out_shape=jax.ShapeDtypeStruct((n_pad, dout_p), jnp.float32),
        grid=(nt,),
        in_specs=[
            pl.BlockSpec((tn, h_p), lambda i: (i, 0)),
            pl.BlockSpec((1, h_p), lambda i: (0, 0)),
            pl.BlockSpec((1, h_p), lambda i: (0, 0)),
            pl.BlockSpec((h_p, dout_p), lambda i: (0, 0)),  # W2 resident
        ],
        out_specs=pl.BlockSpec((tn, dout_p), lambda i: (i, 0)),
        compiler_params=pltpu.CompilerParams(
            dimension_semantics=("parallel",),
            vmem_limit_bytes=VMEM_LIMIT),
    )(h_bf, a, b, w2t)

    return out_p[:n, :out_dim]


# --------------------------------- references ---------------------------------
def mlp1_reference_f32(x, w1, w2, gamma, beta):
    """Pure-f32 PyTorch-semantics reference."""
    h = x @ w1.T
    mean = h.mean(axis=0, keepdims=True)
    var = ((h - mean) ** 2).mean(axis=0, keepdims=True)
    h = (h - mean) * jax.lax.rsqrt(var + EPS)
    h = h * gamma.reshape(1, -1) + beta.reshape(1, -1)
    h = jnp.maximum(h, 0.0)
    return h @ w2.T


def mlp1_reference_bf16(x, w1, w2, gamma, beta):
    """Reference that mimics the kernel's bf16 cast points (tight check)."""
    n = x.shape[0]
    h32 = jnp.dot(x.astype(jnp.bfloat16), w1.T.astype(jnp.bfloat16),
                  preferred_element_type=jnp.float32)
    mean = h32.sum(axis=0, keepdims=True) / n
    var = jnp.maximum((h32 * h32).sum(axis=0, keepdims=True) / n - mean * mean, 0.0)
    a = gamma.reshape(1, -1) * jax.lax.rsqrt(var + EPS)
    b = beta.reshape(1, -1) - mean * a
    hb = h32.astype(jnp.bfloat16).astype(jnp.float32)
    hn = jnp.maximum(hb * a + b, 0.0)
    return jnp.dot(hn.astype(jnp.bfloat16), w2.T.astype(jnp.bfloat16),
                   preferred_element_type=jnp.float32)


if __name__ == "__main__":
    # Small shapes implied by the forward: x is [batch, input_dim].
    batch, input_dim, hidden_dim, output_dim = 8, 16, 32, 8

    key = jax.random.PRNGKey(0)
    kx, k1, k2 = jax.random.split(key, 3)

    x = jax.random.normal(kx, (batch, input_dim), dtype=jnp.float32)
    w1 = jax.random.uniform(k1, (hidden_dim, input_dim), jnp.float32,
                            minval=-1.0 / np.sqrt(input_dim),
                            maxval=1.0 / np.sqrt(input_dim))
    w2 = jax.random.uniform(k2, (output_dim, hidden_dim), jnp.float32,
                            minval=-1.0 / np.sqrt(hidden_dim),
                            maxval=1.0 / np.sqrt(hidden_dim))
    gamma = jnp.ones((hidden_dim,), jnp.float32)   # BatchNorm1d weight init
    beta = jnp.zeros((hidden_dim,), jnp.float32)   # BatchNorm1d bias init

    # Parameter prep happens ONCE (transpose / pad / bf16 cast), not per call.
    w1t, w2t, gamma_p, beta_p = prepare_params(w1, w2, gamma, beta)

    out = mlp1_forward(x, w1t, w2t, gamma_p, beta_p, out_dim=output_dim)
    out = jax.block_until_ready(out)

    # Tight check vs a reference with the same bf16 cast points.
    ref_bf16 = mlp1_reference_bf16(x, w1, w2, gamma, beta)
    np.testing.assert_allclose(np.asarray(out), np.asarray(ref_bf16),
                               rtol=2e-4, atol=2e-4)
    # Loose check vs the pure-f32 PyTorch-semantics reference (bf16 matmul error).
    ref_f32 = mlp1_reference_f32(x, w1, w2, gamma, beta)
    np.testing.assert_allclose(np.asarray(out), np.asarray(ref_f32),
                               rtol=1e-1, atol=1e-1)
    print("KERNEL_OK")
</pallas_src>

<mosaic_0001>
module attributes {stable_mosaic.version = 11 : i64} {
  func.func @mlp1_pass1_kernel(%arg0: i32, %arg1: memref<16x128xbf16, #tpu.memory_space<vmem>>, %arg2: memref<128x128xbf16, #tpu.memory_space<vmem>>, %arg3: memref<16x128xbf16, #tpu.memory_space<vmem>>, %arg4: memref<1x128xf32, #tpu.memory_space<vmem>>, %arg5: memref<1x128xf32, #tpu.memory_space<vmem>>) attributes {dimension_semantics = [#tpu.dimension_semantics<arbitrary>], iteration_bounds = array<i64: 1>, scalar_prefetch = 0 : i64, scratch_operands = 0 : i64, tpu.core_type = #tpu.core_type<tc>, window_params = [{transform_indices = @transform_0, window_bounds = array<i64: 16, 128>}, {pipeline_mode = #tpu.pipeline_mode<synchronous>, transform_indices = @transform_1, window_bounds = array<i64: 128, 128>}, {transform_indices = @transform_2, window_bounds = array<i64: 16, 128>}, {pipeline_mode = #tpu.pipeline_mode<synchronous>, transform_indices = @transform_3, window_bounds = array<i64: 1, 128>}, {pipeline_mode = #tpu.pipeline_mode<synchronous>, transform_indices = @transform_4, window_bounds = array<i64: 1, 128>}]} {
    %c0_i32 = arith.constant 0 : i32
    %0 = arith.cmpi eq, %arg0, %c0_i32 : i32
    %1 = arith.extui %0 : i1 to i32
    %c0_i32_0 = arith.constant 0 : i32
    %2 = arith.cmpi ne, %1, %c0_i32_0 : i32
    scf.if %2 {
      %cst_16 = arith.constant 0.000000e+00 : f32
      %19 = vector.broadcast %cst_16 : f32 to vector<1x128xf32>
      %c0_17 = arith.constant 0 : index
      %c0_18 = arith.constant 0 : index
      %20 = vector.load %arg4[%c0_17, %c0_18] : memref<1x128xf32, #tpu.memory_space<vmem>>, vector<1x128xf32>
      tpu.vector_store %arg4[%c0_17, %c0_18], %19 {strides = array<i32>} : memref<1x128xf32, #tpu.memory_space<vmem>>, vector<1x128xf32>,
      %cst_19 = arith.constant 0.000000e+00 : f32
      %21 = vector.broadcast %cst_19 : f32 to vector<1x128xf32>
      %c0_20 = arith.constant 0 : index
      %c0_21 = arith.constant 0 : index
      %22 = vector.load %arg5[%c0_20, %c0_21] : memref<1x128xf32, #tpu.memory_space<vmem>>, vector<1x128xf32>
      tpu.vector_store %arg5[%c0_20, %c0_21], %21 {strides = array<i32>} : memref<1x128xf32, #tpu.memory_space<vmem>>, vector<1x128xf32>,
    } else {
    }
    %c0 = arith.constant 0 : index
    %c0_1 = arith.constant 0 : index
    %3 = vector.load %arg1[%c0, %c0_1] : memref<16x128xbf16, #tpu.memory_space<vmem>>, vector<16x128xbf16>
    %c0_2 = arith.constant 0 : index
    %c0_3 = arith.constant 0 : index
    %4 = vector.load %arg2[%c0_2, %c0_3] : memref<128x128xbf16, #tpu.memory_space<vmem>>, vector<128x128xbf16>
    %cst = arith.constant dense<0.000000e+00> : vector<16x128xf32>
    %5 = tpu.matmul %3, %4, %cst {dimension_numbers = #tpu.dot_dimension_numbers<[1], [0], [0], [1], [0, 0, 1, 1], [], []>} : vector<16x128xbf16>, vector<128x128xbf16>, vector<16x128xf32> -> vector<16x128xf32>
    %6 = arith.truncf %5 : vector<16x128xf32> to vector<16x128xbf16>
    %c0_4 = arith.constant 0 : index
    %c0_5 = arith.constant 0 : index
    %7 = vector.load %arg3[%c0_4, %c0_5] : memref<16x128xbf16, #tpu.memory_space<vmem>>, vector<16x128xbf16>
    tpu.vector_store %arg3[%c0_4, %c0_5], %6 {strides = array<i32>} : memref<16x128xbf16, #tpu.memory_space<vmem>>, vector<16x128xbf16>,
    %c0_6 = arith.constant 0 : index
    %c0_7 = arith.constant 0 : index
    %8 = vector.load %arg4[%c0_6, %c0_7] : memref<1x128xf32, #tpu.memory_space<vmem>>, vector<1x128xf32>
    %cst_8 = arith.constant dense<0.000000e+00> : vector<128xf32>
    %9 = vector.multi_reduction <add>, %5, %cst_8 [0] : vector<16x128xf32> to vector<128xf32>
    %10 = vector.shape_cast %9 : vector<128xf32> to vector<1x128xf32>
    %11 = arith.addf %8, %10 : vector<1x128xf32>
    %c0_9 = arith.constant 0 : index
    %c0_10 = arith.constant 0 : index
    %12 = vector.load %arg4[%c0_9, %c0_10] : memref<1x128xf32, #tpu.memory_space<vmem>>, vector<1x128xf32>
    tpu.vector_store %arg4[%c0_9, %c0_10], %11 {strides = array<i32>} : memref<1x128xf32, #tpu.memory_space<vmem>>, vector<1x128xf32>,
    %c0_11 = arith.constant 0 : index
    %c0_12 = arith.constant 0 : index
    %13 = vector.load %arg5[%c0_11, %c0_12] : memref<1x128xf32, #tpu.memory_space<vmem>>, vector<1x128xf32>
    %14 = arith.mulf %5, %5 : vector<16x128xf32>
    %cst_13 = arith.constant dense<0.000000e+00> : vector<128xf32>
    %15 = vector.multi_reduction <add>, %14, %cst_13 [0] : vector<16x128xf32> to vector<128xf32>
    %16 = vector.shape_cast %15 : vector<128xf32> to vector<1x128xf32>
    %17 = arith.addf %13, %16 : vector<1x128xf32>
    %c0_14 = arith.constant 0 : index
    %c0_15 = arith.constant 0 : index
    %18 = vector.load %arg5[%c0_14, %c0_15] : memref<1x128xf32, #tpu.memory_space<vmem>>, vector<1x128xf32>
    tpu.vector_store %arg5[%c0_14, %c0_15], %17 {strides = array<i32>} : memref<1x128xf32, #tpu.memory_space<vmem>>, vector<1x128xf32>,
    return
  }
  func.func @transform_0(%arg0: i32) -> (i32, i32) {
    %c0_i32 = arith.constant 0 : i32
    %c0_i32_0 = arith.constant 0 : i32
    return %arg0, %c0_i32 : i32, i32
  }
  func.func @transform_1(%arg0: i32) -> (i32, i32) {
    %c0_i32 = arith.constant 0 : i32
    %c0_i32_0 = arith.constant 0 : i32
    %c0_i32_1 = arith.constant 0 : i32
    return %c0_i32, %c0_i32_0 : i32, i32
  }
  func.func @transform_2(%arg0: i32) -> (i32, i32) {
    %c0_i32 = arith.constant 0 : i32
    %c0_i32_0 = arith.constant 0 : i32
    return %arg0, %c0_i32 : i32, i32
  }
  func.func @transform_3(%arg0: i32) -> (i32, i32) {
    %c0_i32 = arith.constant 0 : i32
    %c0_i32_0 = arith.constant 0 : i32
    %c0_i32_1 = arith.constant 0 : i32
    return %c0_i32, %c0_i32_0 : i32, i32
  }
  func.func @transform_4(%arg0: i32) -> (i32, i32) {
    %c0_i32 = arith.constant 0 : i32
    %c0_i32_0 = arith.constant 0 : i32
    %c0_i32_1 = arith.constant 0 : i32
    return %c0_i32, %c0_i32_0 : i32, i32
  }
}

module attributes {stable_mosaic.version = 11 : i64} {
  func.func @mlp1_pass2_kernel(%arg0: i32, %arg1: memref<16x128xbf16, #tpu.memory_space<vmem>>, %arg2: memref<1x128xf32, #tpu.memory_space<vmem>>, %arg3: memref<1x128xf32, #tpu.memory_space<vmem>>, %arg4: memref<128x128xbf16, #tpu.memory_space<vmem>>, %arg5: memref<16x128xf32, #tpu.memory_space<vmem>>) attributes {dimension_semantics = [#tpu.dimension_semantics<parallel>], iteration_bounds = array<i64: 1>, scalar_prefetch = 0 : i64, scratch_operands = 0 : i64, tpu.core_type = #tpu.core_type<tc>, window_params = [{transform_indices = @transform_0, window_bounds = array<i64: 16, 128>}, {pipeline_mode = #tpu.pipeline_mode<synchronous>, transform_indices = @transform_1, window_bounds = array<i64: 1, 128>}, {pipeline_mode = #tpu.pipeline_mode<synchronous>, transform_indices = @transform_2, window_bounds = array<i64: 1, 128>}, {pipeline_mode = #tpu.pipeline_mode<synchronous>, transform_indices = @transform_3, window_bounds = array<i64: 128, 128>}, {transform_indices = @transform_4, window_bounds = array<i64: 16, 128>}]} {
    %c0 = arith.constant 0 : index
    %c0_0 = arith.constant 0 : index
    %0 = vector.load %arg1[%c0, %c0_0] : memref<16x128xbf16, #tpu.memory_space<vmem>>, vector<16x128xbf16>
    %1 = arith.extf %0 : vector<16x128xbf16> to vector<16x128xf32>
    %c0_1 = arith.constant 0 : index
    %c0_2 = arith.constant 0 : index
    %2 = vector.load %arg2[%c0_1, %c0_2] : memref<1x128xf32, #tpu.memory_space<vmem>>, vector<1x128xf32>
    %3 = vector.broadcast %2 : vector<1x128xf32> to vector<16x128xf32>
    %4 = arith.mulf %1, %3 : vector<16x128xf32>
    %c0_3 = arith.constant 0 : index
    %c0_4 = arith.constant 0 : index
    %5 = vector.load %arg3[%c0_3, %c0_4] : memref<1x128xf32, #tpu.memory_space<vmem>>, vector<1x128xf32>
    %6 = vector.broadcast %5 : vector<1x128xf32> to vector<16x128xf32>
    %7 = arith.addf %4, %6 : vector<16x128xf32>
    %cst = arith.constant 0.000000e+00 : f32
    %8 = vector.broadcast %cst : f32 to vector<16x128xf32>
    %9 = arith.maximumf %7, %8 : vector<16x128xf32>
    %10 = arith.truncf %9 : vector<16x128xf32> to vector<16x128xbf16>
    %c0_5 = arith.constant 0 : index
    %c0_6 = arith.constant 0 : index
    %11 = vector.load %arg4[%c0_5, %c0_6] : memref<128x128xbf16, #tpu.memory_space<vmem>>, vector<128x128xbf16>
    %cst_7 = arith.constant dense<0.000000e+00> : vector<16x128xf32>
    %12 = tpu.matmul %10, %11, %cst_7 {dimension_numbers = #tpu.dot_dimension_numbers<[1], [0], [0], [1], [0, 0, 1, 1], [], []>} : vector<16x128xbf16>, vector<128x128xbf16>, vector<16x128xf32> -> vector<16x128xf32>
    %c0_8 = arith.constant 0 : index
    %c0_9 = arith.constant 0 : index
    %13 = vector.load %arg5[%c0_8, %c0_9] : memref<16x128xf32, #tpu.memory_space<vmem>>, vector<16x128xf32>
    tpu.vector_store %arg5[%c0_8, %c0_9], %12 {strides = array<i32>} : memref<16x128xf32, #tpu.memory_space<vmem>>, vector<16x128xf32>,
    return
  }
  func.func @transform_0(%arg0: i32) -> (i32, i32) {
    %c0_i32 = arith.constant 0 : i32
    %c0_i32_0 = arith.constant 0 : i32
    return %arg0, %c0_i32 : i32, i32
  }
  func.func @transform_1(%arg0: i32) -> (i32, i32) {
    %c0_i32 = arith.constant 0 : i32
    %c0_i32_0 = arith.constant 0 : i32
    %c0_i32_1 = arith.constant 0 : i32
    return %c0_i32, %c0_i32_0 : i32, i32
  }
  func.func @transform_2(%arg0: i32) -> (i32, i32) {
    %c0_i32 = arith.constant 0 : i32
    %c0_i32_0 = arith.constant 0 : i32
    %c0_i32_1 = arith.constant 0 : i32
    return %c0_i32, %c0_i32_0 : i32, i32
  }
  func.func @transform_3(%arg0: i32) -> (i32, i32) {
    %c0_i32 = arith.constant 0 : i32
    %c0_i32_0 = arith.constant 0 : i32
    %c0_i32_1 = arith.constant 0 : i32
    return %c0_i32, %c0_i32_0 : i32, i32
  }
  func.func @transform_4(%arg0: i32) -> (i32, i32) {
    %c0_i32 = arith.constant 0 : i32
    %c0_i32_0 = arith.constant 0 : i32
    return %arg0, %c0_i32 : i32, i32
  }
}

</mosaic_0001>

<bundles_post_ra>
// kernel: mlp1_forward.3
= control target key start
LH: loop header
LB: loop body
LE: loop exit
PB: predicated region body
PF: predicated region fallthrough
CT: control target
= control target key end

     0   :  { %v207_v0 = vmov 0.0   ;;  %vm208_vm0 = vmmov 0   ;;  %s273_s3 = inlined_call_operand.vmem [shape: bf16[128,128], index: 3, kind: input, shape index: {}]   ;;  %s274_s0 = inlined_call_operand.vmem [shape: bf16[16,128], index: 0, kind: input, shape index: {}]   ;;  %s275_s1 = inlined_call_operand.vmem [shape: f32[1,128], index: 1, kind: input, shape index: {}]   ;;  %s276_s2 = inlined_call_operand.vmem [shape: f32[1,128], index: 2, kind: input, shape index: {}]   ;;  %s277_s4 = inlined_call_operand.vmem [shape: f32[16,128], index: 4, kind: output, shape index: {}]  }
   0x1   :  { %177 = vmatprep.subr.bf16.mxu0 %v207_v0  ;;  %v199_v1 = vld [vmem:[%s273_s3] sm:$0xff]   ;;  %193 = vmatprep.mubr.msk.bf16.mxu0 %vm208_vm0, %v207_v0  ;;  %v200_v2 = vld [vmem:[%s273_s3 + $0x8] sm:$0xff]   ;;  %v201_v3 = vld [vmem:[%s273_s3 + $0x10] sm:$0xff]  }
   0x2   :  { %178 = vmatpush3.bf16.msra.mxu0 %v199_v1  ;;  %v202_v4 = vld [vmem:[%s273_s3 + $0x18] sm:$0xff]   ;;  %v165_v5 = vld [vmem:[%s274_s0] sm:$0xff]   ;;  %v204_v12 = vld [vmem:[%s273_s3 + $0x28] sm:$0xff]  }
   0x3   :  { %179 = vmatprep.subr.bf16.mxu0 %v207_v0  ;;  %v166_v6 = vunpack.c.l.bf16 %v165_v5  ;;  %v167_v7 = vunpack.c.h.bf16 %v165_v5  ;;  %v203_v8 = vld [vmem:[%s273_s3 + $0x20] sm:$0xff]   ;;  %v205_v16 = vld [vmem:[%s273_s3 + $0x30] sm:$0xff]   ;;  %v206_v19 = vld [vmem:[%s273_s3 + $0x38] sm:$0xff]  }
   0x4   :  { %v154_v9 = vld [vmem:[%s275_s1] ss:$0 sm:$0xff] }
   0x5   :  { %v29_v10 = vmul.f32 %v166_v6, %v154_v9  ;;  %v30_v11 = vmul.f32 %v167_v7, %v154_v9  ;;  %v155_v13 = vld [vmem:[%s276_s2] ss:$0 sm:$0xff] }
   0x6   :  { %180 = vmatpush3.bf16.msra.mxu0 %v200_v2 }
   0x7   :  { %181 = vmatprep.subr.bf16.mxu0 %v207_v0  ;;  %v38_v14 = vadd.f32 %v155_v13, %v29_v10  ;;  %v39_v15 = vadd.f32 %v155_v13, %v30_v11 }
   0x9   :  { %v40_v17 = vmax.f32 %v38_v14, 0.0  ;;  %v41_v18 = vmax.f32 %v39_v15, 0.0 }
   0xa   :  { %182 = vmatpush3.bf16.msra.mxu0 %v201_v3 }
   0xb   :  { %183 = vmatprep.subr.bf16.mxu0 %v207_v0  ;;  %v42_v20 = vpack.c.bf16 %v41_v18, %v40_v17 }
   0xe   :  { %184 = vmatpush3.bf16.msra.mxu0 %v202_v4 }
   0xf   :  { %185 = vmatprep.subr.bf16.mxu0 %v207_v0 }
  0x12   :  { %186 = vmatpush3.bf16.msra.mxu0 %v203_v8 }
  0x13   :  { %187 = vmatprep.subr.bf16.mxu0 %v207_v0 }
  0x16   :  { %188 = vmatpush3.bf16.msra.mxu0 %v204_v12 }
  0x17   :  { %189 = vmatprep.subr.bf16.mxu0 %v207_v0 }
  0x1a   :  { %190 = vmatpush3.bf16.msra.mxu0 %v205_v16 }
  0x1b   :  { %191 = vmatprep.subr.bf16.mxu0 %v207_v0 }
  0x1e   :  { %192 = vmatpush3.bf16.msra.mxu0 %v206_v19 }
  0x21   :  { %194 = vmatmul.mubr.bf16.vlgmr.msra.gmra.mrb[0].mxu0 %v42_v20 }
  0xf4   :  { %v141_v21 = vpop.f32.mrb[0].mxu0 }
  0xf5   :  { %148 = vst [vmem:[%s277_s4] sm:$0xff] %v141_v21  ;;  %v195_v22 = vpop.f32.mrb[1].mxu0 }
  0xf6   :  { %v144_v23 = vpop.f32.mrb[2].mxu0 }
  0xf7   :  { %149 = vst [vmem:[%s277_s4 + $0x8] sm:$0xff] %v144_v23  ;;  %v196_v24 = vpop.f32.mrb[3].mxu0 }

// kernel: mlp1_forward.2
= control target key start
LH: loop header
LB: loop body
LE: loop exit
PB: predicated region body
PF: predicated region fallthrough
CT: control target
= control target key end

     0   :  { %10 = vsyncpa [#allocation3], 0  ;;  %s278_s15 = smov [#allocation2]   ;;  %s344_s0 = inlined_call_operand.vmem [shape: bf16[16,128], index: 0, kind: input, shape index: {}]   ;;  %s345_s1 = inlined_call_operand.hbm [shape: bf16[128,128], index: 1, kind: input, shape index: {}]   ;;  %s346_s2 = inlined_call_operand.vmem [shape: bf16[16,128], index: 2, kind: output, shape index: {0}]   ;;  %s347_s3 = inlined_call_operand.vmem [shape: f32[1,128], index: 3, kind: output, shape index: {1}]   ;;  %s348_s4 = inlined_call_operand.vmem [shape: f32[1,128], index: 4, kind: output, shape index: {2}]  }
   0x1   :  { %s18_s16 = sshll.u32 %s278_s15, 4  ;;  %s254_s19 = scalar_lea.hbm %s345_s1, 1024  ;;  %s19_s16 = int_to_ptr.vmem [resolvable:$true] %s18_s16 }
   0x2   :  { %p255_p0 = scmp.ne.s32.totalorder %s345_s1, %s254_s19  ;;  %p258_p1 = scmp.lt.u32.totalorder %s254_s19, %s345_s1 }
   0x4   :  { %p260_p2 = pnand %p258_p1, %p255_p0 }
   0x6   :  { %263 = shalt.err (!%p260_p2)
}
   0x7   :  { %s264_s24 = scalar_lea.vmem %s19_s16, 1024  ;;  %p269_p4 = scmp.lt.s32.totalorder %s19_s16, %s19_s16 }
   0x8   :  { %p265_p3 = scmp.ne.s32.totalorder %s19_s16, %s264_s24  ;;  %p270_p5 = scmp.lt.s32.totalorder %s264_s24, %s264_s24 }
   0xa   :  { %p271_p6 = por %p270_p5, %p269_p4 }
   0xc   :  { %p272_p7 = pnand %p271_p6, %p265_p3 }
   0xe   :  { %275 = shalt.err (!%p272_p7)
}
   0xf   :  { %s279_s25 = smov 64   ;;  %s280_s26 = smov 4  }
  0x10   :  { %24 = dma.hbm_to_vmem [thread:$0]  %s345_s1, 1024, %s19_s16, [#allocation3], %s279_s25, %s279_s25, %s280_s26  }
  0x11   :  { %276 = dma.done.wait [#allocation3], 1024  }
  0x12   :  { %277 = vsyncadd [#allocation3], 4294966272  ;;  %v281_v0 = vmov 0.0   ;;  %vm282_vm0 = vmmov 0   ;;  %v245_v1 = vld [vmem:[#allocation2] sm:$0xff]   ;;  %v246_v2 = vld [vmem:[#allocation2 + $0x8] sm:$0xff]  }
  0x13   :  { %220 = vmatprep.subr.bf16.mxu0 %v281_v0  ;;  %33 = vst [vmem:[%s347_s3] sm:$0x1] %v281_v0  ;;  %34 = vst [vmem:[%s348_s4] sm:$0x1] %v281_v0  ;;  %236 = vmatprep.mubr.msk.bf16.mxu0 %vm282_vm0, %v281_v0  ;;  %v247_v3 = vld [vmem:[#allocation2 + $0x10] sm:$0xff]   ;;  %v248_v4 = vld [vmem:[#allocation2 + $0x18] sm:$0xff]  }
  0x14   :  { %221 = vmatpush3.bf16.msra.mxu0 %v245_v1  ;;  %v249_v5 = vld [vmem:[#allocation2 + $0x20] sm:$0xff]   ;;  %v250_v6 = vld [vmem:[#allocation2 + $0x28] sm:$0xff]   ;;  %v251_v7 = vld [vmem:[#allocation2 + $0x30] sm:$0xff]  }
  0x15   :  { %222 = vmatprep.subr.bf16.mxu0 %v281_v0  ;;  %v252_v8 = vld [vmem:[#allocation2 + $0x38] sm:$0xff]   ;;  %v253_v9 = vld [vmem:[%s344_s0] sm:$0xff]  }
  0x18   :  { %223 = vmatpush3.bf16.msra.mxu0 %v246_v2 }
  0x19   :  { %224 = vmatprep.subr.bf16.mxu0 %v281_v0 }
  0x1a   :  { %v158_v28 = vld [vmem:[%s347_s3] sm:$0x1] }
  0x1b   :  { %v168_v31 = vld [vmem:[%s348_s4] sm:$0x1] }
  0x1c   :  { %225 = vmatpush3.bf16.msra.mxu0 %v247_v3 }
  0x1d   :  { %226 = vmatprep.subr.bf16.mxu0 %v281_v0 }
  0x20   :  { %227 = vmatpush3.bf16.msra.mxu0 %v248_v4 }
  0x21   :  { %228 = vmatprep.subr.bf16.mxu0 %v281_v0 }
  0x24   :  { %229 = vmatpush3.bf16.msra.mxu0 %v249_v5 }
  0x25   :  { %230 = vmatprep.subr.bf16.mxu0 %v281_v0 }
  0x28   :  { %231 = vmatpush3.bf16.msra.mxu0 %v250_v6 }
  0x29   :  { %232 = vmatprep.subr.bf16.mxu0 %v281_v0 }
  0x2c   :  { %233 = vmatpush3.bf16.msra.mxu0 %v251_v7 }
  0x2d   :  { %234 = vmatprep.subr.bf16.mxu0 %v281_v0 }
  0x30   :  { %235 = vmatpush3.bf16.msra.mxu0 %v252_v8 }
  0x33   :  { %237 = vmatmul.mubr.bf16.vlgmr.msra.gmra.mrb[0].mxu0 %v253_v9 }
 0x106   :  { %v141_v10 = vpop.f32.mrb[0].mxu0 }
 0x107   :  { %v238_v11 = vpop.f32.mrb[1].mxu0  ;;  %v169_v13 = vmul.f32 %v141_v10, %v141_v10 }
 0x108   :  { %v144_v12 = vpop.f32.mrb[2].mxu0 }
 0x109   :  { %v209_v14 = vpack.c.bf16 %v144_v12, %v141_v10  ;;  %v159_v15 = vadd.f32 %v144_v12, %v141_v10  ;;  %v170_v16 = vmul.f32 %v144_v12, %v144_v12  ;;  %v239_v17 = vpop.f32.mrb[3].mxu0 }
 0x10b   :  { %210 = vst [vmem:[%s346_s2] sm:$0xff] %v209_v14   ;;  %v160_v18 = vrot.slane %v159_v15, 4  ;;  %v171_v19 = vadd.f32 %v170_v16, %v169_v13 }
 0x10d   :  { %v161_v20 = vadd.f32 %v160_v18, %v159_v15  ;;  %v172_v21 = vrot.slane %v171_v19, 4 }
 0x10f   :  { %v162_v22 = vrot.slane %v161_v20, 2  ;;  %v173_v23 = vadd.f32 %v172_v21, %v171_v19 }
 0x111   :  { %v163_v24 = vadd.f32 %v162_v22, %v161_v20  ;;  %v174_v25 = vrot.slane %v173_v23, 2 }
 0x113   :  { %v164_v26 = vrot.slane %v163_v24, 1  ;;  %v175_v27 = vadd.f32 %v174_v25, %v173_v23 }
 0x115   :  { %v165_v29 = vadd.f32 %v164_v26, %v163_v24  ;;  %v176_v30 = vrot.slane %v175_v27, 1 }
 0x117   :  { %v166_v32 = vadd.f32 %v165_v29, %v158_v28  ;;  %v177_v33 = vadd.f32 %v176_v30, %v175_v27 }
 0x119   :  { %167 = vst [vmem:[%s347_s3] sm:$0x1] %v166_v32  ;;  %v178_v34 = vadd.f32 %v177_v33, %v168_v31 }
 0x11b   :  { %179 = vst [vmem:[%s348_s4] sm:$0x1] %v178_v34 }
 0x11c   :  { %192 = vsyncpa [#allocation3], 1 }

</bundles_post_ra>
